<compile_context>
chip_gen: v7x
topology: tpu7x:2x2x1
jax: 0.10.0
libtpu: 0.0.40
codegen_flags: <defaults>
</compile_context>

<pallas_src>
import functools
import math

import jax
import jax.numpy as jnp
from jax.experimental import pallas as pl
from jax.experimental.pallas import tpu as pltpu

EPS = 1e-6
_LANE = 128
_PAD_LOGIT = -1e4  # sigmoid(-1e4) == 0.0 exactly in f32
_DEF_VMEM_CAP = 64 << 20  # conservative fallback if the HW query fails


def _round_up(x, m):
    return (x + m - 1) // m * m


_HW_CACHE = []


def _query_hw():
    """Returns (vmem_capacity_bytes, num_tensorcores); defensive best-effort."""
    if _HW_CACHE:
        return _HW_CACHE[0]
    vmem, cores = _DEF_VMEM_CAP, 1
    fn = getattr(pltpu, "get_tpu_info", None)
    if fn is not None:
        try:
            info = fn()
        except Exception:
            info = None
        if info is not None:
            v = getattr(info, "vmem_capacity_bytes", None)
            if isinstance(v, int) and v > 0:
                vmem = v
            c = None
            for name in ("num_cores", "num_tensorcores", "tensorcore_count",
                         "core_count"):
                cand = getattr(info, name, None)
                if isinstance(cand, int) and cand > 0:
                    c = cand
                    break
            if c is None:
                # Heuristic: <=64 MiB per-core VMEM => v7x-class chip, 2 TCs.
                c = 2 if vmem <= (64 << 20) else 1
            cores = c
    _HW_CACHE.append((vmem, cores))
    return _HW_CACHE[0]


def _dice_kernel(pred_ref, tgt_ref, inter_ref, card_ref, *,
                 tr, r_total, k_per_split, num_tiles, uneven, ragged):
    """Grid = (n_split, k_per_split); axis 1 walks row tiles of one split.

    pred_ref, tgt_ref  : (N, TR, 128) VMEM tiles in the input dtypes
    inter_ref, card_ref: (1, N, 128) f32 partial sums, resident across axis 1
                         (output block index depends only on the split).
    """
    s = pl.program_id(0)
    k = pl.program_id(1)

    @pl.when(k == 0)
    def _():
        inter_ref[...] = jnp.zeros_like(inter_ref)
        card_ref[...] = jnp.zeros_like(card_ref)

    g = s * k_per_split + k  # global tile index

    def _accumulate():
        pv = jax.nn.sigmoid(pred_ref[...].astype(jnp.float32))
        tv = tgt_ref[...].astype(jnp.float32)
        if ragged:
            # Rows >= r_total in the (non-dividing) edge tile hold unspecified
            # data; zero them with a select (NOT a multiply, in case the
            # padding contains NaN/Inf).
            row0 = g * tr
            rows = jax.lax.broadcasted_iota(jnp.int32, (1, tr, _LANE), 1)
            valid = rows < (r_total - row0)
            pv = jnp.where(valid, pv, 0.0)
            tv = jnp.where(valid, tv, 0.0)
        # Reduce over the row (sublane) axis only; the lane axis (128) stays
        # lane-dense and is folded in the wrapper epilogue.
        inter_ref[...] += jnp.sum(pv * tv, axis=1)[None]
        card_ref[...] += jnp.sum(pv + tv, axis=1)[None]

    if uneven:
        # Uneven split: steps past the last real tile re-read a clamped tile
        # (see index_map); skip their accumulation.
        pl.when(g < num_tiles)(_accumulate)
    else:
        _accumulate()


@functools.partial(jax.jit, static_argnames=("block_bytes", "n_split"))
def dice_metric(pred, target, block_bytes=None, n_split=None):
    assert pred.shape == target.shape
    n = pred.shape[0]
    d = math.prod(pred.shape[1:]) if len(pred.shape) > 1 else 1

    p_isz = jnp.dtype(pred.dtype).itemsize
    t_isz = jnp.dtype(target.dtype).itemsize
    # Native sublane packing: 8 rows for 4-byte, 16 for 2-byte, 32 for 1-byte.
    pack = min(32, max(8, 32 // max(1, min(p_isz, t_isz, 4))))

    vmem_cap, n_cores = _query_hw()

    # ---- lane-dense (N, R, 128) view ---------------------------------------
    r_total = pl.cdiv(d, _LANE)
    d_128 = r_total * _LANE

    # ---- tile sizing --------------------------------------------------------
    if block_bytes is None:
        block_bytes = (12 << 20) if vmem_cap >= (100 << 20) else (5 << 20)
    bytes_per_row = n * _LANE * max(p_isz, t_isz)            # per input
    tr = max(pack, (block_bytes // bytes_per_row) // pack * pack)

    # VMEM budget: double-buffered inputs + ~4 block-sized f32 temporaries.
    slack = 2 << 20
    budget = int(0.75 * vmem_cap)
    per_row_vmem = n * _LANE * (2 * (p_isz + t_isz) + 4 * 4)
    tr_vmem_cap = max(pack, ((budget - slack) // per_row_vmem) // pack * pack)

    tr = min(tr, tr_vmem_cap, _round_up(r_total, pack))
    tr = max(tr, pack)
    num_tiles = pl.cdiv(r_total, tr)

    # ---- reduction split (2 TensorCores on v7x; 1 elsewhere) ----------------
    if n_split is None:
        if (n_cores >= 2 and num_tiles >= 2
                and (num_tiles % n_cores == 0 or num_tiles >= 8 * n_cores)):
            n_split = n_cores
        else:
            n_split = 1
    n_split = max(1, min(int(n_split), num_tiles))
    k_per_split = pl.cdiv(num_tiles, n_split)
    uneven = (n_split * k_per_split != num_tiles)
    ragged = (num_tiles * tr != r_total)

    # ---- wrapper-side reshape; pad ONLY to the 128-lane boundary ------------
    pred2 = pred.reshape(n, d)
    tgt2 = target.reshape(n, d)
    if d_128 != d:
        pad = d_128 - d  # <= 127 elements per sample
        pred2 = jnp.pad(pred2, ((0, 0), (0, pad)), constant_values=_PAD_LOGIT)
        tgt2 = jnp.pad(tgt2, ((0, 0), (0, pad)), constant_values=0)
    pred3 = pred2.reshape(n, r_total, _LANE)
    tgt3 = tgt2.reshape(n, r_total, _LANE)

    # ---- explicit VMEM limit -------------------------------------------------
    in_block = n * tr * _LANE
    vmem_limit = (2 * in_block * (p_isz + t_isz)   # double-buffered input blocks
                  + 4 * in_block * 4               # in-kernel f32 temporaries
                  + 4 * n * _LANE * 4              # resident accumulator blocks
                  + slack)
    vmem_limit = max(8 << 20, min(int(vmem_limit), int(0.9 * vmem_cap)))

    grid = (n_split, k_per_split)

    def in_map(s, k):
        g = s * k_per_split + k
        if uneven:
            g = jnp.minimum(g, num_tiles - 1)  # clamp; kernel guard skips it
        return (0, g, 0)

    def out_map(s, k):
        return (s, 0, 0)

    kernel = functools.partial(
        _dice_kernel, tr=tr, r_total=r_total, k_per_split=k_per_split,
        num_tiles=num_tiles, uneven=uneven, ragged=ragged)

    inter_p, card_p = pl.pallas_call(
        kernel,
        out_shape=(
            jax.ShapeDtypeStruct((n_split, n, _LANE), jnp.float32),
            jax.ShapeDtypeStruct((n_split, n, _LANE), jnp.float32),
        ),
        grid_spec=pltpu.PrefetchScalarGridSpec(
            num_scalar_prefetch=0,
            grid=grid,
            in_specs=[
                pl.BlockSpec((n, tr, _LANE), in_map),
                pl.BlockSpec((n, tr, _LANE), in_map),
            ],
            out_specs=[
                pl.BlockSpec((1, n, _LANE), out_map),
                pl.BlockSpec((1, n, _LANE), out_map),
            ],
        ),
        compiler_params=pltpu.CompilerParams(
            dimension_semantics=("parallel", "arbitrary"),
            vmem_limit_bytes=vmem_limit,
        ),
    )(pred3, tgt3)

    # Tiny epilogue on (n_split, N, 128) partials.
    inter = jnp.sum(inter_p, axis=(0, 2))  # (N,)
    card = jnp.sum(card_p, axis=(0, 2))    # (N,)
    dice = 2.0 * inter / (card + EPS)
    return jnp.mean(dice)


def _dice_ref(pred, target):
    # Pure-JAX reference mirroring the PyTorch module.
    p = jax.nn.sigmoid(pred.astype(jnp.float32))
    t = target.astype(jnp.float32)
    inter = jnp.sum(p * t, axis=(1, 2, 3))
    card = jnp.sum(p + t, axis=(1, 2, 3))
    return jnp.mean(2.0 * inter / (card + EPS))


if __name__ == "__main__":
    key = jax.random.PRNGKey(0)
    k1, k2, k3, k4, k5, k6 = jax.random.split(key, 6)

    # Test 1: 128-aligned D -> free reshape, single tile, no masking.
    N, C, H, W = 2, 4, 16, 16
    pred = jax.random.normal(k1, (N, C, H, W), dtype=jnp.float32)
    target = (jax.random.uniform(k2, (N, C, H, W)) > 0.5).astype(jnp.float32)
    out = dice_metric(pred, target)
    jax.block_until_ready(out)
    ref = _dice_ref(pred, target)
    assert jnp.allclose(out, ref, rtol=1e-4, atol=1e-6), (out, ref)

    # Test 2: non-128-aligned D + tiny tiles -> lane pad + in-kernel row mask.
    pred_b = jax.random.normal(k3, (2, 3, 20, 20), dtype=jnp.float32)
    target_b = (jax.random.uniform(k4, (2, 3, 20, 20)) > 0.5).astype(jnp.float32)
    out_b = dice_metric(pred_b, target_b, block_bytes=8192)
    jax.block_until_ready(out_b)
    ref_b = _dice_ref(pred_b, target_b)
    assert jnp.allclose(out_b, ref_b, rtol=1e-4, atol=1e-6), (out_b, ref_b)

    # Test 3: bf16 logits, forced 2-way split with an ODD tile count ->
    # exercises the uneven-split guard, index clamp, ragged mask and the
    # in-kernel f32 cast, regardless of how many TensorCores the chip has.
    pred_c = jax.random.normal(k5, (2, 3, 40, 40), dtype=jnp.bfloat16)
    target_c = (jax.random.uniform(k6, (2, 3, 40, 40)) > 0.5).astype(jnp.float32)
    out_c = dice_metric(pred_c, target_c, block_bytes=8192, n_split=2)
    jax.block_until_ready(out_c)
    ref_c = _dice_ref(pred_c, target_c)
    assert jnp.allclose(out_c, ref_c, rtol=1e-4, atol=1e-6), (out_c, ref_c)

    print("KERNEL_OK")
</pallas_src>

<mosaic_0001>
module attributes {stable_mosaic.version = 11 : i64} {
  func.func @_dice_kernel(%arg0: i32, %arg1: i32, %arg2: memref<2x8x128xf32, #tpu.memory_space<vmem>>, %arg3: memref<2x8x128xf32, #tpu.memory_space<vmem>>, %arg4: memref<1x2x128xf32, #tpu.memory_space<vmem>>, %arg5: memref<1x2x128xf32, #tpu.memory_space<vmem>>) attributes {dimension_semantics = [#tpu.dimension_semantics<parallel>, #tpu.dimension_semantics<arbitrary>], iteration_bounds = array<i64: 1, 1>, scalar_prefetch = 0 : i64, scratch_operands = 0 : i64, tpu.core_type = #tpu.core_type<tc>, window_params = [{transform_indices = @transform_0, window_bounds = array<i64: 2, 8, 128>}, {transform_indices = @transform_1, window_bounds = array<i64: 2, 8, 128>}, {transform_indices = @transform_2, window_bounds = array<i64: 1, 2, 128>}, {transform_indices = @transform_3, window_bounds = array<i64: 1, 2, 128>}]} {
    %c0_i32 = arith.constant 0 : i32
    %0 = arith.cmpi eq, %arg1, %c0_i32 : i32
    %1 = arith.extui %0 : i1 to i32
    %c0_i32_0 = arith.constant 0 : i32
    %2 = arith.cmpi ne, %1, %c0_i32_0 : i32
    scf.if %2 {
      %cst_20 = arith.constant 0.000000e+00 : f32
      %22 = vector.broadcast %cst_20 : f32 to vector<1x2x128xf32>
      %c0_21 = arith.constant 0 : index
      %c0_22 = arith.constant 0 : index
      %c0_23 = arith.constant 0 : index
      %23 = vector.load %arg4[%c0_21, %c0_22, %c0_23] : memref<1x2x128xf32, #tpu.memory_space<vmem>>, vector<1x2x128xf32>
      tpu.vector_store %arg4[%c0_21, %c0_22, %c0_23], %22 {strides = array<i32>} : memref<1x2x128xf32, #tpu.memory_space<vmem>>, vector<1x2x128xf32>,
      %cst_24 = arith.constant 0.000000e+00 : f32
      %24 = vector.broadcast %cst_24 : f32 to vector<1x2x128xf32>
      %c0_25 = arith.constant 0 : index
      %c0_26 = arith.constant 0 : index
      %c0_27 = arith.constant 0 : index
      %25 = vector.load %arg5[%c0_25, %c0_26, %c0_27] : memref<1x2x128xf32, #tpu.memory_space<vmem>>, vector<1x2x128xf32>
      tpu.vector_store %arg5[%c0_25, %c0_26, %c0_27], %24 {strides = array<i32>} : memref<1x2x128xf32, #tpu.memory_space<vmem>>, vector<1x2x128xf32>,
    } else {
    }
    %c0 = arith.constant 0 : index
    %c0_1 = arith.constant 0 : index
    %c0_2 = arith.constant 0 : index
    %3 = vector.load %arg2[%c0, %c0_1, %c0_2] : memref<2x8x128xf32, #tpu.memory_space<vmem>>, vector<2x8x128xf32>
    %4 = arith.negf %3 : vector<2x8x128xf32>
    %5 = math.exp %4 : vector<2x8x128xf32>
    %cst = arith.constant 1.000000e+00 : f32
    %6 = vector.broadcast %cst : f32 to vector<2x8x128xf32>
    %7 = arith.addf %6, %5 : vector<2x8x128xf32>
    %8 = arith.divf %6, %7 : vector<2x8x128xf32>
    %c0_3 = arith.constant 0 : index
    %c0_4 = arith.constant 0 : index
    %c0_5 = arith.constant 0 : index
    %9 = vector.load %arg3[%c0_3, %c0_4, %c0_5] : memref<2x8x128xf32, #tpu.memory_space<vmem>>, vector<2x8x128xf32>
    %c0_6 = arith.constant 0 : index
    %c0_7 = arith.constant 0 : index
    %c0_8 = arith.constant 0 : index
    %10 = vector.load %arg4[%c0_6, %c0_7, %c0_8] : memref<1x2x128xf32, #tpu.memory_space<vmem>>, vector<1x2x128xf32>
    %11 = arith.mulf %8, %9 : vector<2x8x128xf32>
    %cst_9 = arith.constant dense<0.000000e+00> : vector<2x128xf32>
    %12 = vector.multi_reduction <add>, %11, %cst_9 [1] : vector<2x8x128xf32> to vector<2x128xf32>
    %13 = vector.shape_cast %12 : vector<2x128xf32> to vector<1x2x128xf32>
    %14 = arith.addf %10, %13 : vector<1x2x128xf32>
    %c0_10 = arith.constant 0 : index
    %c0_11 = arith.constant 0 : index
    %c0_12 = arith.constant 0 : index
    %15 = vector.load %arg4[%c0_10, %c0_11, %c0_12] : memref<1x2x128xf32, #tpu.memory_space<vmem>>, vector<1x2x128xf32>
    tpu.vector_store %arg4[%c0_10, %c0_11, %c0_12], %14 {strides = array<i32>} : memref<1x2x128xf32, #tpu.memory_space<vmem>>, vector<1x2x128xf32>,
    %c0_13 = arith.constant 0 : index
    %c0_14 = arith.constant 0 : index
    %c0_15 = arith.constant 0 : index
    %16 = vector.load %arg5[%c0_13, %c0_14, %c0_15] : memref<1x2x128xf32, #tpu.memory_space<vmem>>, vector<1x2x128xf32>
    %17 = arith.addf %8, %9 : vector<2x8x128xf32>
    %cst_16 = arith.constant dense<0.000000e+00> : vector<2x128xf32>
    %18 = vector.multi_reduction <add>, %17, %cst_16 [1] : vector<2x8x128xf32> to vector<2x128xf32>
    %19 = vector.shape_cast %18 : vector<2x128xf32> to vector<1x2x128xf32>
    %20 = arith.addf %16, %19 : vector<1x2x128xf32>
    %c0_17 = arith.constant 0 : index
    %c0_18 = arith.constant 0 : index
    %c0_19 = arith.constant 0 : index
    %21 = vector.load %arg5[%c0_17, %c0_18, %c0_19] : memref<1x2x128xf32, #tpu.memory_space<vmem>>, vector<1x2x128xf32>
    tpu.vector_store %arg5[%c0_17, %c0_18, %c0_19], %20 {strides = array<i32>} : memref<1x2x128xf32, #tpu.memory_space<vmem>>, vector<1x2x128xf32>,
    return
  }
  func.func @transform_0(%arg0: i32, %arg1: i32) -> (i32, i32, i32) {
    %c1_i32 = arith.constant 1 : i32
    %0 = arith.muli %arg0, %c1_i32 : i32
    %1 = arith.addi %0, %arg1 : i32
    %c0_i32 = arith.constant 0 : i32
    %c0_i32_0 = arith.constant 0 : i32
    %c0_i32_1 = arith.constant 0 : i32
    return %c0_i32, %1, %c0_i32_0 : i32, i32, i32
  }
  func.func @transform_1(%arg0: i32, %arg1: i32) -> (i32, i32, i32) {
    %c1_i32 = arith.constant 1 : i32
    %0 = arith.muli %arg0, %c1_i32 : i32
    %1 = arith.addi %0, %arg1 : i32
    %c0_i32 = arith.constant 0 : i32
    %c0_i32_0 = arith.constant 0 : i32
    %c0_i32_1 = arith.constant 0 : i32
    return %c0_i32, %1, %c0_i32_0 : i32, i32, i32
  }
  func.func @transform_2(%arg0: i32, %arg1: i32) -> (i32, i32, i32) {
    %c0_i32 = arith.constant 0 : i32
    %c0_i32_0 = arith.constant 0 : i32
    %c0_i32_1 = arith.constant 0 : i32
    return %arg0, %c0_i32, %c0_i32_0 : i32, i32, i32
  }
  func.func @transform_3(%arg0: i32, %arg1: i32) -> (i32, i32, i32) {
    %c0_i32 = arith.constant 0 : i32
    %c0_i32_0 = arith.constant 0 : i32
    %c0_i32_1 = arith.constant 0 : i32
    return %arg0, %c0_i32, %c0_i32_0 : i32, i32, i32
  }
}

</mosaic_0001>

<bundles_post_ra>
// kernel: dice_metric.1
= control target key start
LH: loop header
LB: loop body
LE: loop exit
PB: predicated region body
PF: predicated region fallthrough
CT: control target
= control target key end

     0   :  { %v143_v0 = vmov 0.0   ;;  %vm86_vm0 = vcmask 1041409   ;;  %s194_s2 = inlined_call_operand.vmem [shape: f32[1,2,128], index: 2, kind: output, shape index: {0}]   ;;  %s195_s3 = inlined_call_operand.vmem [shape: f32[1,2,128], index: 3, kind: output, shape index: {1}]   ;;  %s196_s0 = inlined_call_operand.vmem [shape: f32[2,8,128], index: 0, kind: input, shape index: {}]   ;;  %s197_s1 = inlined_call_operand.vmem [shape: f32[2,8,128], index: 1, kind: input, shape index: {}]  }
   0x1   :  { %51 = vst [vmem:[%s194_s2] sm:$0x3] %v143_v0  ;;  %52 = vst [vmem:[%s195_s3] sm:$0x3] %v143_v0  ;;  %v53_v1 = vld [vmem:[%s196_s0] sm:$0xff]  ;;  %v54_v2 = vld [vmem:[%s196_s0 + $0x8] sm:$0xff] }
   0x2   :  { %v132_v3 = vmul.f32 -1.442695, %v53_v1  ;;  %v133_v4 = vmul.f32 -1.442695, %v54_v2  ;;  %v67_v9 = vld [vmem:[%s197_s1] sm:$0xff]  ;;  %v68_v10 = vld [vmem:[%s197_s1 + $0x8] sm:$0xff] }
   0x4   :  { %135 = vpow2.f32 %v132_v3 }
   0x5   :  { %137 = vpow2.f32 %v133_v4 }
   0x8   :  { %v69_v39 = vld [vmem:[%s194_s2] sm:$0x3] }
   0x9   :  { %v91_v41 = vld [vmem:[%s195_s3] sm:$0x3] }
   0xe   :  { %v136_v5 = vpop.eup %135 }
   0xf   :  { %v138_v6 = vpop.eup %137  ;;  %v61_v7 = vadd.f32 1.0, %v136_v5 }
  0x10   :  { %v62_v8 = vadd.f32 1.0, %v138_v6 }
  0x11   :  { %139 = vrcp.f32 %v61_v7 }
  0x12   :  { %141 = vrcp.f32 %v62_v8 }
  0x1b   :  { %v140_v11 = vpop.eup %139 }
  0x1c   :  { %v142_v12 = vpop.eup %141  ;;  %v70_v13 = vmul.f32 %v140_v11, %v67_v9  ;;  %v92_v14 = vadd.f32 %v140_v11, %v67_v9 }
  0x1d   :  { %v71_v15 = vmul.f32 %v142_v12, %v68_v10  ;;  %v93_v16 = vadd.f32 %v142_v12, %v68_v10 }
  0x1e   :  { %v72_v17 = vrot.slane %v70_v13, 4  ;;  %v94_v18 = vrot.slane %v92_v14, 4 }
  0x1f   :  { %v78_v19 = vrot.slane %v71_v15, 4  ;;  %v100_v20 = vrot.slane %v93_v16, 4 }
  0x20   :  { %v73_v21 = vadd.f32 %v72_v17, %v70_v13  ;;  %v95_v22 = vadd.f32 %v94_v18, %v92_v14 }
  0x21   :  { %v79_v23 = vadd.f32 %v78_v19, %v71_v15  ;;  %v101_v24 = vadd.f32 %v100_v20, %v93_v16 }
  0x22   :  { %v74_v25 = vrot.slane %v73_v21, 2  ;;  %v96_v26 = vrot.slane %v95_v22, 2 }
  0x23   :  { %v80_v27 = vrot.slane %v79_v23, 2  ;;  %v102_v28 = vrot.slane %v101_v24, 2 }
  0x24   :  { %v75_v29 = vadd.f32 %v74_v25, %v73_v21  ;;  %v97_v30 = vadd.f32 %v96_v26, %v95_v22 }
  0x25   :  { %v81_v31 = vadd.f32 %v80_v27, %v79_v23  ;;  %v103_v32 = vadd.f32 %v102_v28, %v101_v24 }
  0x26   :  { %v76_v33 = vrot.slane %v75_v29, 1  ;;  %v98_v34 = vrot.slane %v97_v30, 1 }
  0x27   :  { %v82_v35 = vrot.slane %v81_v31, 1  ;;  %v104_v36 = vrot.slane %v103_v32, 1 }
  0x28   :  { %v77_v37 = vadd.f32 %v76_v33, %v75_v29  ;;  %v99_v38 = vadd.f32 %v98_v34, %v97_v30 }
  0x29   :  { %v83_v40 = vadd.f32 %v82_v35, %v81_v31  ;;  %v105_v42 = vadd.f32 %v104_v36, %v103_v32 }
  0x2b   :  { %v87_v43 = vsel %vm86_vm0, %v83_v40, %v77_v37  ;;  %v108_v44 = vsel %vm86_vm0, %v105_v42, %v99_v38 }
  0x2c   :  { %v89_v45 = vadd.f32 %v87_v43, %v69_v39  ;;  %v110_v46 = vadd.f32 %v108_v44, %v91_v41 }
  0x2e   :  { %90 = vst [vmem:[%s194_s2] sm:$0x3] %v89_v45  ;;  %111 = vst [vmem:[%s195_s3] sm:$0x3] %v110_v46 }

</bundles_post_ra>
